<compile_context>
chip_gen: v7x
topology: tpu7x:2x2x1
jax: 0.10.0
libtpu: 0.0.40
codegen_flags: <defaults>
</compile_context>

<pallas_src>
import math

import jax
import jax.numpy as jnp
from jax import lax
from jax.experimental import pallas as pl
from jax.experimental.pallas import tpu as pltpu

# ---------------- config (small, consistent with the module) ----------------
B = 2            # batch
T = 8            # num_tokens
D = 32           # emb_dim
H = 4            # n_heads
KVH = 2          # n_kv_groups (== num_kv_heads)
HD = D // H      # head_dim = 8
GROUP = H // KVH # group_size = 2
HIDDEN = 64      # hidden_dim
EPS = 1e-5       # rms_norm_eps
ROPE_BASE = 10000.0
DTYPE = jnp.float32

BT = B * T                  # 16 rows of activations
NQ = H * BT                 # 64 rows of Q'  (h, b, t)
NKV = KVH * BT              # 32 rows of K'/V'  (g, b, t)
NQK = NQ + NKV              # 96 rows of stacked Q'|K'
NSTREAM = H + 2 * KVH       # 8 projection streams (4 q heads, 2 k heads, 2 v heads)

# ---- f32 constants slab layout (width = NKV = 32) ----
CST_BIAS = 0                    # rows [0, NQ)        additive attention bias (NQ, NKV)
CST_COS = NQ                    # rows [64, 160)      cos table (NQK, HD) in lanes 0:HD
CST_SIN = CST_COS + NQK         # rows [160, 256)     sin table (NQK, HD)
CST_R = CST_SIN + NQK           # rows [256, 264)     rotate-half matrix (HD, HD)
CST_ROWS = CST_R + HD           # 264
CST_W = NKV                     # 32

# ---- bf16 weight slab layout (width = 2*HIDDEN = 128) ----
WGT_W12 = 0                     # rows [0, 32)        fc1^T | fc2^T, norm2-folded (D, 2*HIDDEN)
WGT_QKV = D                     # rows [32, 288)      8 streams x (D, HD), norm1-folded (+q scale)
WGT_WO = WGT_QKV + NSTREAM * D  # rows [288, 320)     wo^T (H*HD, D)
WGT_W3 = WGT_WO + H * HD        # rows [320, 448)     w3^T zero-padded to (2*HIDDEN, D)
WGT_ROWS = WGT_W3 + 2 * HIDDEN  # 448
WGT_W = 2 * HIDDEN              # 128


# ------------------------------ Pallas kernel --------------------------------
def _block_kernel(x_ref, cst_ref, wgt_ref, o_ref):
    f32, bf16 = jnp.float32, jnp.bfloat16

    x = x_ref[...]                                                  # (BT, D) f32

    # ---- RMSNorm 1 (gamma folded into the projection weights) ----
    xn = x * lax.rsqrt(jnp.mean(x * x, axis=-1, keepdims=True) + EPS)
    xnb = xn.astype(bf16)

    # ---- per-stream projections; results stack on the SUBLANE axis (no lane shuffles) ----
    def proj(s):
        w = wgt_ref[WGT_QKV + s * D:WGT_QKV + (s + 1) * D, 0:HD]    # (D, HD) bf16
        return jnp.dot(xnb, w, preferred_element_type=f32)          # (BT, HD)

    qk = jnp.concatenate([proj(s) for s in range(H + KVH)], axis=0)       # (NQK, HD) q0..q3,k0,k1
    v = jnp.concatenate([proj(H + KVH + g) for g in range(KVH)], axis=0)  # (NKV, HD) v0,v1

    # ---- RoPE on stacked Q'|K': t*cos + rotate_half(t)*sin (rotate-half = exact f32 matmul) ----
    cos_t = cst_ref[CST_COS:CST_COS + NQK, 0:HD]                    # (NQK, HD) f32
    sin_t = cst_ref[CST_SIN:CST_SIN + NQK, 0:HD]
    rot = jnp.dot(qk, cst_ref[CST_R:CST_R + HD, 0:HD],
                  preferred_element_type=f32)                       # (NQK, HD)
    qk = qk * cos_t + rot * sin_t

    q = qk[0:NQ, :]                                                 # (NQ, HD)  rows (h, b, t)
    k = qk[NQ:NQK, :]                                               # (NKV, HD) rows (g, b, t)

    # ---- single masked scores matmul over every (batch, head); 1/sqrt(hd) folded into Wq ----
    s = lax.dot_general(q.astype(bf16), k.astype(bf16),
                        (((1,), (1,)), ((), ())),
                        preferred_element_type=f32)                 # (NQ, NKV)
    s = s + cst_ref[CST_BIAS:CST_BIAS + NQ, :]                      # additive mask bias

    m = jnp.max(s, axis=-1, keepdims=True)
    p = jnp.exp(s - m)
    p = p * pl.reciprocal(jnp.sum(p, axis=-1, keepdims=True), approx=True)

    ctx = jnp.dot(p.astype(bf16), v.astype(bf16),
                  preferred_element_type=f32)                       # (NQ, HD); masked cols -> 0

    # ---- output projection: per-head accumulated matmuls on sublane slices + residual ----
    h1 = x
    for h in range(H):
        wo_h = wgt_ref[WGT_WO + h * HD:WGT_WO + (h + 1) * HD, 0:D]  # (HD, D) bf16
        h1 = h1 + jnp.dot(ctx[h * BT:(h + 1) * BT, :].astype(bf16), wo_h,
                          preferred_element_type=f32)               # (BT, D)

    # ---- RMSNorm 2 (gamma folded into w12) ----
    hn = h1 * lax.rsqrt(jnp.mean(h1 * h1, axis=-1, keepdims=True) + EPS)

    # ---- SwiGLU: fused gate/up matmul (full 128 lanes); silu(a)*gate via an XLU lane roll ----
    ag = jnp.dot(hn.astype(bf16), wgt_ref[WGT_W12:WGT_W12 + D, :],
                 preferred_element_type=f32)                        # (BT, 2*HIDDEN)
    ff = ag * jax.nn.sigmoid(ag) * pltpu.roll(ag, HIDDEN, 1)        # lanes [0,HIDDEN) = silu(a)*g
    ffo = jnp.dot(ff.astype(bf16), wgt_ref[WGT_W3:WGT_W3 + 2 * HIDDEN, 0:D],
                  preferred_element_type=f32)                       # garbage half hits zero rows

    o_ref[...] = (h1 + ffo).astype(o_ref.dtype)


# --------------------- one-time constant / weight packing --------------------
def pack_constants(n1, n2, wq, wk, wv, wo, w1, w2, w3, cos, sin):
    """Pack every weight/table into two slabs (f32 constants, bf16 weights). Call once."""
    f32, bf16 = jnp.float32, jnp.bfloat16

    # additive attention bias: rows (h, b, t) x cols (g, b, t)
    r = jnp.arange(NQ)
    c = jnp.arange(NKV)
    h_r, b_r, t_r = r // BT, (r // T) % B, r % T
    g_c, b_c, t_c = c // BT, (c // T) % B, c % T
    valid = ((b_r[:, None] == b_c[None, :])
             & ((h_r[:, None] // GROUP) == g_c[None, :])
             & (t_c[None, :] <= t_r[:, None]))
    bias = jnp.where(valid, 0.0, -1e30).astype(f32)                 # (NQ, NKV)

    # RoPE tables for the (h|g, b, t)-stacked rows (position = row % T)
    cos_full = jnp.concatenate([cos, cos], axis=-1)                 # (T, HD)
    sin_full = jnp.concatenate([sin, sin], axis=-1)
    reps = NQK // T
    cos_t = jnp.tile(cos_full, (reps, 1)).astype(f32)               # (NQK, HD)
    sin_t = jnp.tile(sin_full, (reps, 1)).astype(f32)

    # rotate-half as a matmul: u @ R = [-u2, u1]  (entries 0/+-1, exact in f32)
    half = HD // 2
    R = jnp.zeros((HD, HD), f32)
    R = R.at[half + jnp.arange(half), jnp.arange(half)].set(-1.0)
    R = R.at[jnp.arange(half), half + jnp.arange(half)].set(1.0)

    def pad_to(a, width):
        return jnp.pad(a, ((0, 0), (0, width - a.shape[1])))

    cst = jnp.concatenate([bias, pad_to(cos_t, CST_W), pad_to(sin_t, CST_W),
                           pad_to(R, CST_W)], axis=0).astype(f32)   # (CST_ROWS, CST_W)

    # per-stream qkv weights: norm1 gamma folded, q streams also carry 1/sqrt(head_dim)
    inv_sqrt_hd = 1.0 / math.sqrt(HD)
    wqT = wq.T * n1[:, None] * inv_sqrt_hd                          # (D, H*HD)
    wkT = wk.T * n1[:, None]                                        # (D, KVH*HD)
    wvT = wv.T * n1[:, None]
    streams = ([wqT[:, h * HD:(h + 1) * HD] for h in range(H)]
               + [wkT[:, g * HD:(g + 1) * HD] for g in range(KVH)]
               + [wvT[:, g * HD:(g + 1) * HD] for g in range(KVH)])
    wqkv = jnp.concatenate(streams, axis=0)                         # (NSTREAM*D, HD)

    w12 = jnp.concatenate([w1.T, w2.T], axis=-1) * n2[:, None]      # (D, 2*HIDDEN), norm2 folded
    w3p = jnp.concatenate([w3.T, jnp.zeros((HIDDEN, D), jnp.float32)], axis=0)  # (2*HIDDEN, D)

    wgt = jnp.concatenate([w12, pad_to(wqkv, WGT_W), pad_to(wo.T, WGT_W),
                           pad_to(w3p, WGT_W)], axis=0).astype(bf16)  # (WGT_ROWS, WGT_W)
    return cst, wgt


# ------------------------------ wrapper --------------------------------------
@jax.jit
def transformer_block_pallas(x, cst, wgt):
    """x: (B, T, D) f32; cst/wgt: packed slabs from pack_constants."""
    b, t, d = x.shape
    xf = x.reshape(b * t, d)
    z = lambda i: (0, 0)
    out = pl.pallas_call(
        _block_kernel,
        out_shape=jax.ShapeDtypeStruct((b * t, d), x.dtype),
        grid_spec=pl.GridSpec(
            grid=(1,),
            in_specs=[
                pl.BlockSpec((BT, D), z),                 # x (flattened)
                pl.BlockSpec((CST_ROWS, CST_W), z),       # f32 constants slab
                pl.BlockSpec((WGT_ROWS, WGT_W), z),       # bf16 weight slab
            ],
            out_specs=pl.BlockSpec((BT, D), z),
        ),
        compiler_params=pltpu.CompilerParams(
            dimension_semantics=("arbitrary",)),
    )(xf, cst, wgt)
    return out.reshape(b, t, d)


# ---------------------- pure-JAX reference (mirrors torch) -------------------
def ref_forward(x, p):
    def rms(y, w):
        return y * lax.rsqrt(jnp.mean(y * y, -1, keepdims=True) + EPS) * w

    xn = rms(x, p["n1"])
    b, t, d = x.shape
    q = (xn @ p["wq"].T).reshape(b, t, H, HD)
    k = (xn @ p["wk"].T).reshape(b, t, KVH, HD)
    v = (xn @ p["wv"].T).reshape(b, t, KVH, HD)

    cos = p["cos"][None, :, None, :]   # (1,T,1,HD/2)
    sin = p["sin"][None, :, None, :]

    def rope(u):
        u1, u2 = u[..., : HD // 2], u[..., HD // 2:]
        return jnp.concatenate([u1 * cos - u2 * sin, u1 * sin + u2 * cos], -1)

    q, k = rope(q), rope(k)
    q = q.transpose(0, 2, 1, 3)
    k = jnp.repeat(k.transpose(0, 2, 1, 3), GROUP, axis=1)
    v = jnp.repeat(v.transpose(0, 2, 1, 3), GROUP, axis=1)

    s = q @ k.transpose(0, 1, 3, 2)
    mask = jnp.triu(jnp.ones((t, t), bool), 1)
    s = jnp.where(mask, -jnp.inf, s)
    a = jax.nn.softmax(s / math.sqrt(HD), axis=-1)
    ctx = (a @ v).transpose(0, 2, 1, 3).reshape(b, t, H * HD)
    attn = ctx @ p["wo"].T

    h1 = x + attn
    hn = rms(h1, p["n2"])
    ff = (jax.nn.silu(hn @ p["w1"].T) * (hn @ p["w2"].T)) @ p["w3"].T
    return h1 + ff


# --------------------------------- main ---------------------------------------
if __name__ == "__main__":
    key = jax.random.PRNGKey(0)
    ks = jax.random.split(key, 10)

    # PyTorch nn.Linear weight shapes: (out_features, in_features)
    wq = 0.05 * jax.random.normal(ks[0], (H * HD, D), DTYPE)
    wk = 0.05 * jax.random.normal(ks[1], (KVH * HD, D), DTYPE)
    wv = 0.05 * jax.random.normal(ks[2], (KVH * HD, D), DTYPE)
    wo = 0.05 * jax.random.normal(ks[3], (D, H * HD), DTYPE)
    w1 = 0.05 * jax.random.normal(ks[4], (HIDDEN, D), DTYPE)   # fc1
    w2 = 0.05 * jax.random.normal(ks[5], (HIDDEN, D), DTYPE)   # fc2
    w3 = 0.05 * jax.random.normal(ks[6], (D, HIDDEN), DTYPE)   # fc3
    n1 = 1.0 + 0.05 * jax.random.normal(ks[7], (D,), DTYPE)    # RMSNorm1 weight
    n2 = 1.0 + 0.05 * jax.random.normal(ks[8], (D,), DTYPE)    # RMSNorm2 weight
    x = jax.random.normal(ks[9], (B, T, D), DTYPE)

    # RoPE tables (precompute_rope_params), positions = arange(T)
    theta = 1.0 / (ROPE_BASE ** (jnp.arange(0, HD, 2, dtype=jnp.float32) / HD))
    freqs = jnp.outer(jnp.arange(T, dtype=jnp.float32), theta)   # (T, HD/2)
    cos, sin = jnp.cos(freqs).astype(DTYPE), jnp.sin(freqs).astype(DTYPE)

    # one-time packing (hoisted out of the per-call path)
    cst, wgt = pack_constants(n1, n2, wq, wk, wv, wo, w1, w2, w3, cos, sin)

    out = transformer_block_pallas(x, cst, wgt)
    jax.block_until_ready(out)

    ref = ref_forward(x, dict(n1=n1, n2=n2, wq=wq, wk=wk, wv=wv, wo=wo,
                              w1=w1, w2=w2, w3=w3, cos=cos, sin=sin))
    assert out.shape == (B, T, D) and out.dtype == DTYPE
    # bf16 MXU operands + approx softmax reciprocal -> relaxed tolerance vs f32 reference
    assert jnp.allclose(out, ref, atol=2e-2, rtol=2e-2), \
        f"max abs err {jnp.max(jnp.abs(out - ref))}"
    print("KERNEL_OK")
</pallas_src>

<mosaic_0001>
module attributes {stable_mosaic.version = 11 : i64} {
  func.func @_block_kernel(%arg0: i32, %arg1: memref<16x32xf32, #tpu.memory_space<vmem>>, %arg2: memref<264x32xf32, #tpu.memory_space<vmem>>, %arg3: memref<448x128xbf16, #tpu.memory_space<vmem>>, %arg4: memref<16x32xf32, #tpu.memory_space<vmem>>) attributes {dimension_semantics = [#tpu.dimension_semantics<arbitrary>], iteration_bounds = array<i64: 1>, scalar_prefetch = 0 : i64, scratch_operands = 0 : i64, tpu.core_type = #tpu.core_type<tc>, window_params = [{pipeline_mode = #tpu.pipeline_mode<synchronous>, transform_indices = @transform_0, window_bounds = array<i64: 16, 32>}, {pipeline_mode = #tpu.pipeline_mode<synchronous>, transform_indices = @transform_1, window_bounds = array<i64: 264, 32>}, {pipeline_mode = #tpu.pipeline_mode<synchronous>, transform_indices = @transform_2, window_bounds = array<i64: 448, 128>}, {pipeline_mode = #tpu.pipeline_mode<synchronous>, transform_indices = @transform_3, window_bounds = array<i64: 16, 32>}]} {
    %c0 = arith.constant 0 : index
    %c0_0 = arith.constant 0 : index
    %0 = vector.load %arg1[%c0, %c0_0] : memref<16x32xf32, #tpu.memory_space<vmem>>, vector<16x32xf32>
    %1 = arith.mulf %0, %0 : vector<16x32xf32>
    %cst = arith.constant dense<0.000000e+00> : vector<16xf32>
    %2 = vector.multi_reduction <add>, %1, %cst [1] : vector<16x32xf32> to vector<16xf32>
    %3 = vector.shape_cast %2 : vector<16xf32> to vector<16x1xf32>
    %cst_1 = arith.constant 3.200000e+01 : f32
    %4 = vector.broadcast %cst_1 : f32 to vector<16x1xf32>
    %5 = arith.divf %3, %4 : vector<16x1xf32>
    %cst_2 = arith.constant 9.99999974E-6 : f32
    %6 = vector.broadcast %cst_2 : f32 to vector<16x1xf32>
    %7 = arith.addf %5, %6 : vector<16x1xf32>
    %8 = math.rsqrt %7 : vector<16x1xf32>
    %9 = vector.broadcast %8 : vector<16x1xf32> to vector<16x32xf32>
    %10 = arith.mulf %0, %9 : vector<16x32xf32>
    %11 = arith.truncf %10 : vector<16x32xf32> to vector<16x32xbf16>
    %c32 = arith.constant 32 : index
    %c0_3 = arith.constant 0 : index
    %12 = vector.load %arg3[%c32, %c0_3] : memref<448x128xbf16, #tpu.memory_space<vmem>>, vector<32x8xbf16>
    %cst_4 = arith.constant dense<0.000000e+00> : vector<16x8xf32>
    %13 = tpu.matmul %11, %12, %cst_4 {dimension_numbers = #tpu.dot_dimension_numbers<[1], [0], [0], [1], [0, 0, 1, 1], [], []>} : vector<16x32xbf16>, vector<32x8xbf16>, vector<16x8xf32> -> vector<16x8xf32>
    %c64 = arith.constant 64 : index
    %c0_5 = arith.constant 0 : index
    %14 = vector.load %arg3[%c64, %c0_5] : memref<448x128xbf16, #tpu.memory_space<vmem>>, vector<32x8xbf16>
    %cst_6 = arith.constant dense<0.000000e+00> : vector<16x8xf32>
    %15 = tpu.matmul %11, %14, %cst_6 {dimension_numbers = #tpu.dot_dimension_numbers<[1], [0], [0], [1], [0, 0, 1, 1], [], []>} : vector<16x32xbf16>, vector<32x8xbf16>, vector<16x8xf32> -> vector<16x8xf32>
    %c96 = arith.constant 96 : index
    %c0_7 = arith.constant 0 : index
    %16 = vector.load %arg3[%c96, %c0_7] : memref<448x128xbf16, #tpu.memory_space<vmem>>, vector<32x8xbf16>
    %cst_8 = arith.constant dense<0.000000e+00> : vector<16x8xf32>
    %17 = tpu.matmul %11, %16, %cst_8 {dimension_numbers = #tpu.dot_dimension_numbers<[1], [0], [0], [1], [0, 0, 1, 1], [], []>} : vector<16x32xbf16>, vector<32x8xbf16>, vector<16x8xf32> -> vector<16x8xf32>
    %c128 = arith.constant 128 : index
    %c0_9 = arith.constant 0 : index
    %18 = vector.load %arg3[%c128, %c0_9] : memref<448x128xbf16, #tpu.memory_space<vmem>>, vector<32x8xbf16>
    %cst_10 = arith.constant dense<0.000000e+00> : vector<16x8xf32>
    %19 = tpu.matmul %11, %18, %cst_10 {dimension_numbers = #tpu.dot_dimension_numbers<[1], [0], [0], [1], [0, 0, 1, 1], [], []>} : vector<16x32xbf16>, vector<32x8xbf16>, vector<16x8xf32> -> vector<16x8xf32>
    %c160 = arith.constant 160 : index
    %c0_11 = arith.constant 0 : index
    %20 = vector.load %arg3[%c160, %c0_11] : memref<448x128xbf16, #tpu.memory_space<vmem>>, vector<32x8xbf16>
    %cst_12 = arith.constant dense<0.000000e+00> : vector<16x8xf32>
    %21 = tpu.matmul %11, %20, %cst_12 {dimension_numbers = #tpu.dot_dimension_numbers<[1], [0], [0], [1], [0, 0, 1, 1], [], []>} : vector<16x32xbf16>, vector<32x8xbf16>, vector<16x8xf32> -> vector<16x8xf32>
    %c192 = arith.constant 192 : index
    %c0_13 = arith.constant 0 : index
    %22 = vector.load %arg3[%c192, %c0_13] : memref<448x128xbf16, #tpu.memory_space<vmem>>, vector<32x8xbf16>
    %cst_14 = arith.constant dense<0.000000e+00> : vector<16x8xf32>
    %23 = tpu.matmul %11, %22, %cst_14 {dimension_numbers = #tpu.dot_dimension_numbers<[1], [0], [0], [1], [0, 0, 1, 1], [], []>} : vector<16x32xbf16>, vector<32x8xbf16>, vector<16x8xf32> -> vector<16x8xf32>
    %24 = tpu.concatenate %13, %15, %17, %19, %21, %23 in 0 : vector<16x8xf32>, vector<16x8xf32>, vector<16x8xf32>, vector<16x8xf32>, vector<16x8xf32>, vector<16x8xf32> -> vector<96x8xf32>
    %c224 = arith.constant 224 : index
    %c0_15 = arith.constant 0 : index
    %25 = vector.load %arg3[%c224, %c0_15] : memref<448x128xbf16, #tpu.memory_space<vmem>>, vector<32x8xbf16>
    %cst_16 = arith.constant dense<0.000000e+00> : vector<16x8xf32>
    %26 = tpu.matmul %11, %25, %cst_16 {dimension_numbers = #tpu.dot_dimension_numbers<[1], [0], [0], [1], [0, 0, 1, 1], [], []>} : vector<16x32xbf16>, vector<32x8xbf16>, vector<16x8xf32> -> vector<16x8xf32>
    %c256 = arith.constant 256 : index
    %c0_17 = arith.constant 0 : index
    %27 = vector.load %arg3[%c256, %c0_17] : memref<448x128xbf16, #tpu.memory_space<vmem>>, vector<32x8xbf16>
    %cst_18 = arith.constant dense<0.000000e+00> : vector<16x8xf32>
    %28 = tpu.matmul %11, %27, %cst_18 {dimension_numbers = #tpu.dot_dimension_numbers<[1], [0], [0], [1], [0, 0, 1, 1], [], []>} : vector<16x32xbf16>, vector<32x8xbf16>, vector<16x8xf32> -> vector<16x8xf32>
    %29 = tpu.concatenate %26, %28 in 0 : vector<16x8xf32>, vector<16x8xf32> -> vector<32x8xf32>
    %c64_19 = arith.constant 64 : index
    %c0_20 = arith.constant 0 : index
    %30 = vector.load %arg2[%c64_19, %c0_20] : memref<264x32xf32, #tpu.memory_space<vmem>>, vector<96x8xf32>
    %c160_21 = arith.constant 160 : index
    %c0_22 = arith.constant 0 : index
    %31 = vector.load %arg2[%c160_21, %c0_22] : memref<264x32xf32, #tpu.memory_space<vmem>>, vector<96x8xf32>
    %c256_23 = arith.constant 256 : index
    %c0_24 = arith.constant 0 : index
    %32 = vector.load %arg2[%c256_23, %c0_24] : memref<264x32xf32, #tpu.memory_space<vmem>>, vector<8x8xf32>
    %cst_25 = arith.constant dense<0.000000e+00> : vector<96x8xf32>
    %33 = tpu.matmul %24, %32, %cst_25 {dimension_numbers = #tpu.dot_dimension_numbers<[1], [0], [0], [1], [0, 0, 1, 1], [], []>} : vector<96x8xf32>, vector<8x8xf32>, vector<96x8xf32> -> vector<96x8xf32>
    %34 = arith.mulf %24, %30 : vector<96x8xf32>
    %35 = arith.mulf %33, %31 : vector<96x8xf32>
    %36 = arith.addf %34, %35 : vector<96x8xf32>
    %37 = vector.extract_strided_slice %36 {offsets = [0, 0], sizes = [64, 8], strides = [1, 1]} : vector<96x8xf32> to vector<64x8xf32>
    %38 = vector.extract_strided_slice %36 {offsets = [64, 0], sizes = [32, 8], strides = [1, 1]} : vector<96x8xf32> to vector<32x8xf32>
    %39 = arith.truncf %37 : vector<64x8xf32> to vector<64x8xbf16>
    %40 = arith.truncf %38 : vector<32x8xf32> to vector<32x8xbf16>
    %cst_26 = arith.constant dense<0.000000e+00> : vector<64x32xf32>
    %41 = tpu.matmul %39, %40, %cst_26 {dimension_numbers = #tpu.dot_dimension_numbers<[1], [1], [0], [0], [0, 0, 1, 0], [], []>} : vector<64x8xbf16>, vector<32x8xbf16>, vector<64x32xf32> -> vector<64x32xf32>
    %c0_27 = arith.constant 0 : index
    %c0_28 = arith.constant 0 : index
    %42 = vector.load %arg2[%c0_27, %c0_28] : memref<264x32xf32, #tpu.memory_space<vmem>>, vector<64x32xf32>
    %43 = arith.addf %41, %42 : vector<64x32xf32>
    %cst_29 = arith.constant dense<0xFF800000> : vector<64xf32>
    %44 = vector.multi_reduction <maximumf>, %43, %cst_29 [1] : vector<64x32xf32> to vector<64xf32>
    %45 = vector.shape_cast %44 : vector<64xf32> to vector<64x1xf32>
    %46 = vector.broadcast %45 : vector<64x1xf32> to vector<64x32xf32>
    %47 = arith.subf %43, %46 : vector<64x32xf32>
    %48 = math.exp %47 : vector<64x32xf32>
    %cst_30 = arith.constant dense<0.000000e+00> : vector<64xf32>
    %49 = vector.multi_reduction <add>, %48, %cst_30 [1] : vector<64x32xf32> to vector<64xf32>
    %50 = vector.shape_cast %49 : vector<64xf32> to vector<64x1xf32>
    %51 = tpu.reciprocal %50 {approx = true} : vector<64x1xf32> -> vector<64x1xf32>
    %52 = vector.broadcast %51 : vector<64x1xf32> to vector<64x32xf32>
    %53 = arith.mulf %48, %52 : vector<64x32xf32>
    %54 = arith.truncf %53 : vector<64x32xf32> to vector<64x32xbf16>
    %55 = arith.truncf %29 : vector<32x8xf32> to vector<32x8xbf16>
    %cst_31 = arith.constant dense<0.000000e+00> : vector<64x8xf32>
    %56 = tpu.matmul %54, %55, %cst_31 {dimension_numbers = #tpu.dot_dimension_numbers<[1], [0], [0], [1], [0, 0, 1, 1], [], []>} : vector<64x32xbf16>, vector<32x8xbf16>, vector<64x8xf32> -> vector<64x8xf32>
    %c288 = arith.constant 288 : index
    %c0_32 = arith.constant 0 : index
    %57 = vector.load %arg3[%c288, %c0_32] : memref<448x128xbf16, #tpu.memory_space<vmem>>, vector<8x32xbf16>
    %58 = vector.extract_strided_slice %56 {offsets = [0, 0], sizes = [16, 8], strides = [1, 1]} : vector<64x8xf32> to vector<16x8xf32>
    %59 = arith.truncf %58 : vector<16x8xf32> to vector<16x8xbf16>
    %cst_33 = arith.constant dense<0.000000e+00> : vector<16x32xf32>
    %60 = tpu.matmul %59, %57, %cst_33 {dimension_numbers = #tpu.dot_dimension_numbers<[1], [0], [0], [1], [0, 0, 1, 1], [], []>} : vector<16x8xbf16>, vector<8x32xbf16>, vector<16x32xf32> -> vector<16x32xf32>
    %61 = arith.addf %0, %60 : vector<16x32xf32>
    %c296 = arith.constant 296 : index
    %c0_34 = arith.constant 0 : index
    %62 = vector.load %arg3[%c296, %c0_34] : memref<448x128xbf16, #tpu.memory_space<vmem>>, vector<8x32xbf16>
    %63 = vector.extract_strided_slice %56 {offsets = [16, 0], sizes = [16, 8], strides = [1, 1]} : vector<64x8xf32> to vector<16x8xf32>
    %64 = arith.truncf %63 : vector<16x8xf32> to vector<16x8xbf16>
    %cst_35 = arith.constant dense<0.000000e+00> : vector<16x32xf32>
    %65 = tpu.matmul %64, %62, %cst_35 {dimension_numbers = #tpu.dot_dimension_numbers<[1], [0], [0], [1], [0, 0, 1, 1], [], []>} : vector<16x8xbf16>, vector<8x32xbf16>, vector<16x32xf32> -> vector<16x32xf32>
    %66 = arith.addf %61, %65 : vector<16x32xf32>
    %c304 = arith.constant 304 : index
    %c0_36 = arith.constant 0 : index
    %67 = vector.load %arg3[%c304, %c0_36] : memref<448x128xbf16, #tpu.memory_space<vmem>>, vector<8x32xbf16>
    %68 = vector.extract_strided_slice %56 {offsets = [32, 0], sizes = [16, 8], strides = [1, 1]} : vector<64x8xf32> to vector<16x8xf32>
    %69 = arith.truncf %68 : vector<16x8xf32> to vector<16x8xbf16>
    %cst_37 = arith.constant dense<0.000000e+00> : vector<16x32xf32>
    %70 = tpu.matmul %69, %67, %cst_37 {dimension_numbers = #tpu.dot_dimension_numbers<[1], [0], [0], [1], [0, 0, 1, 1], [], []>} : vector<16x8xbf16>, vector<8x32xbf16>, vector<16x32xf32> -> vector<16x32xf32>
    %71 = arith.addf %66, %70 : vector<16x32xf32>
    %c312 = arith.constant 312 : index
    %c0_38 = arith.constant 0 : index
    %72 = vector.load %arg3[%c312, %c0_38] : memref<448x128xbf16, #tpu.memory_space<vmem>>, vector<8x32xbf16>
    %73 = vector.extract_strided_slice %56 {offsets = [48, 0], sizes = [16, 8], strides = [1, 1]} : vector<64x8xf32> to vector<16x8xf32>
    %74 = arith.truncf %73 : vector<16x8xf32> to vector<16x8xbf16>
    %cst_39 = arith.constant dense<0.000000e+00> : vector<16x32xf32>
    %75 = tpu.matmul %74, %72, %cst_39 {dimension_numbers = #tpu.dot_dimension_numbers<[1], [0], [0], [1], [0, 0, 1, 1], [], []>} : vector<16x8xbf16>, vector<8x32xbf16>, vector<16x32xf32> -> vector<16x32xf32>
    %76 = arith.addf %71, %75 : vector<16x32xf32>
    %77 = arith.mulf %76, %76 : vector<16x32xf32>
    %cst_40 = arith.constant dense<0.000000e+00> : vector<16xf32>
    %78 = vector.multi_reduction <add>, %77, %cst_40 [1] : vector<16x32xf32> to vector<16xf32>
    %79 = vector.shape_cast %78 : vector<16xf32> to vector<16x1xf32>
    %cst_41 = arith.constant 3.200000e+01 : f32
    %80 = vector.broadcast %cst_41 : f32 to vector<16x1xf32>
    %81 = arith.divf %79, %80 : vector<16x1xf32>
    %cst_42 = arith.constant 9.99999974E-6 : f32
    %82 = vector.broadcast %cst_42 : f32 to vector<16x1xf32>
    %83 = arith.addf %81, %82 : vector<16x1xf32>
    %84 = math.rsqrt %83 : vector<16x1xf32>
    %85 = vector.broadcast %84 : vector<16x1xf32> to vector<16x32xf32>
    %86 = arith.mulf %76, %85 : vector<16x32xf32>
    %87 = arith.truncf %86 : vector<16x32xf32> to vector<16x32xbf16>
    %c0_43 = arith.constant 0 : index
    %c0_44 = arith.constant 0 : index
    %88 = vector.load %arg3[%c0_43, %c0_44] : memref<448x128xbf16, #tpu.memory_space<vmem>>, vector<32x128xbf16>
    %cst_45 = arith.constant dense<0.000000e+00> : vector<16x128xf32>
    %89 = tpu.matmul %87, %88, %cst_45 {dimension_numbers = #tpu.dot_dimension_numbers<[1], [0], [0], [1], [0, 0, 1, 1], [], []>} : vector<16x32xbf16>, vector<32x128xbf16>, vector<16x128xf32> -> vector<16x128xf32>
    %90 = arith.negf %89 : vector<16x128xf32>
    %91 = math.exp %90 : vector<16x128xf32>
    %cst_46 = arith.constant 1.000000e+00 : f32
    %92 = vector.broadcast %cst_46 : f32 to vector<16x128xf32>
    %93 = arith.addf %92, %91 : vector<16x128xf32>
    %94 = arith.divf %92, %93 : vector<16x128xf32>
    %95 = arith.mulf %89, %94 : vector<16x128xf32>
    %c64_i32 = arith.constant 64 : i32
    %96 = tpu.dynamic_rotate %89 by %c64_i32 dim 1 : vector<16x128xf32>, i32 -> vector<16x128xf32>
    %97 = arith.mulf %95, %96 : vector<16x128xf32>
    %98 = arith.truncf %97 : vector<16x128xf32> to vector<16x128xbf16>
    %c320 = arith.constant 320 : index
    %c0_47 = arith.constant 0 : index
    %99 = vector.load %arg3[%c320, %c0_47] : memref<448x128xbf16, #tpu.memory_space<vmem>>, vector<128x32xbf16>
    %cst_48 = arith.constant dense<0.000000e+00> : vector<16x32xf32>
    %100 = tpu.matmul %98, %99, %cst_48 {dimension_numbers = #tpu.dot_dimension_numbers<[1], [0], [0], [1], [0, 0, 1, 1], [], []>} : vector<16x128xbf16>, vector<128x32xbf16>, vector<16x32xf32> -> vector<16x32xf32>
    %101 = arith.addf %76, %100 : vector<16x32xf32>
    %c0_49 = arith.constant 0 : index
    %c0_50 = arith.constant 0 : index
    %102 = vector.load %arg4[%c0_49, %c0_50] : memref<16x32xf32, #tpu.memory_space<vmem>>, vector<16x32xf32>
    tpu.vector_store %arg4[%c0_49, %c0_50], %101 {strides = array<i32>} : memref<16x32xf32, #tpu.memory_space<vmem>>, vector<16x32xf32>,
    return
  }
  func.func @transform_0(%arg0: i32) -> (i32, i32) {
    %c0_i32 = arith.constant 0 : i32
    %c0_i32_0 = arith.constant 0 : i32
    %c0_i32_1 = arith.constant 0 : i32
    return %c0_i32, %c0_i32_0 : i32, i32
  }
  func.func @transform_1(%arg0: i32) -> (i32, i32) {
    %c0_i32 = arith.constant 0 : i32
    %c0_i32_0 = arith.constant 0 : i32
    %c0_i32_1 = arith.constant 0 : i32
    return %c0_i32, %c0_i32_0 : i32, i32
  }
  func.func @transform_2(%arg0: i32) -> (i32, i32) {
    %c0_i32 = arith.constant 0 : i32
    %c0_i32_0 = arith.constant 0 : i32
    %c0_i32_1 = arith.constant 0 : i32
    return %c0_i32, %c0_i32_0 : i32, i32
  }
  func.func @transform_3(%arg0: i32) -> (i32, i32) {
    %c0_i32 = arith.constant 0 : i32
    %c0_i32_0 = arith.constant 0 : i32
    %c0_i32_1 = arith.constant 0 : i32
    return %c0_i32, %c0_i32_0 : i32, i32
  }
}

</mosaic_0001>

<bundles_post_ra>
// kernel: transformer_block_pallas.1
= control target key start
LH: loop header
LB: loop body
LE: loop exit
PB: predicated region body
PF: predicated region fallthrough
CT: control target
= control target key end

     0   :  { %vm20_vm0 = vcmask 261120   ;;  %s2241_s0 = inlined_call_operand.vmem [shape: f32[16,32], index: 0, kind: input, shape index: {}]   ;;  %s2242_s1 = inlined_call_operand.vmem [shape: f32[264,32], index: 1, kind: input, shape index: {}]   ;;  %s2243_s2 = inlined_call_operand.vmem [shape: bf16[448,128], index: 2, kind: input, shape index: {}]   ;;  %s2244_s3 = inlined_call_operand.hbm [shape: f32[16,32], index: 3, kind: output, shape index: {}]  }
   0x1   :  { %v1856_v0 = vld [vmem:[%s2241_s0] sm:$0xff]  ;;  %v1861_v1 = vld [vmem:[%s2241_s0 + $0x8] sm:$0xff] }
   0x2   :  { %v18_v2 = vmul.f32 %v1856_v0, %v1856_v0  ;;  %v19_v3 = vmul.f32 %v1861_v1, %v1861_v1 }
   0x4   :  { %v21_v4 = vsel %vm20_vm0, %v18_v2, 0.0  ;;  %v24_v5 = vsel %vm20_vm0, %v19_v3, 0.0 }
   0x5   :  { %22 = vadd.xlane.f32.xlu0 %v21_v4 }
   0x9   :  { %25 = vadd.xlane.f32.xlu0 %v24_v5 }
   0xa   :  { %8 = vsyncpa [#allocation3], 0  ;;  %v1729_v6 = vld [vmem:[%s2243_s2 + $0x10] sm:$0xff]   ;;  %v1730_v7 = vld [vmem:[%s2243_s2 + $0x20] sm:$0xff]   ;;  %v1827_v8 = vmov 0.0   ;;  %vm1828_vm1 = vmmov 0  }
   0xb   :  { %1545 = vmatprep.subr.bf16.mxu0 %v1827_v8  ;;  %1553 = vmatprep.subr.bf16.mxu1 %v1827_v8  ;;  %v1731_v9 = vld [vmem:[%s2243_s2 + $0x18] sm:$0xff]   ;;  %v1732_v10 = vld [vmem:[%s2243_s2 + $0x28] sm:$0xff]   ;;  %v1733_v21 = vld [vmem:[%s2243_s2 + $0x30] sm:$0xff]   ;;  %vm521_vm2 = vcmask 64512   ;;  %vm992_vm3 = vcmask 1043456   ;;  %s1829_s28 = smov 64  }
   0xc   :  { %1546 = vmatpush3.bf16.msra.mxu0 %v1729_v6  ;;  %1554 = vmatpush3.bf16.msra.mxu1 %v1730_v7  ;;  %v1734_v22 = vld [vmem:[%s2243_s2 + $0x40] sm:$0xff]   ;;  %v1735_v24 = vld [vmem:[%s2243_s2 + $0x38] sm:$0xff]   ;;  %v1736_v25 = vld [vmem:[%s2243_s2 + $0x48] sm:$0xff]  }
   0xd   :  { %1547 = vmatprep.subr.bf16.mxu0 %v1827_v8  ;;  %1555 = vmatprep.subr.bf16.mxu1 %v1827_v8  ;;  %v1737_v26 = vld [vmem:[%s2243_s2 + $0x50] sm:$0xff]   ;;  %v1738_v27 = vld [vmem:[%s2243_s2 + $0x60] sm:$0xff]   ;;  %v1739_v28 = vld [vmem:[%s2243_s2 + $0x58] sm:$0xff]  }
   0xe   :  { %1549 = vmatprep.mubr.msk.bf16.mxu0 %vm1828_vm1, %v1827_v8  ;;  %1557 = vmatprep.mubr.msk.bf16.mxu1 %vm1828_vm1, %v1827_v8  ;;  %v1740_v29 = vld [vmem:[%s2243_s2 + $0x68] sm:$0xff]   ;;  %v1741_v30 = vld [vmem:[%s2243_s2 + $0x70] sm:$0xff]   ;;  %v1742_v31 = vld [vmem:[%s2243_s2 + $0x80] sm:$0xff]  }
   0xf   :  { %v1743_v32 = vld [vmem:[%s2243_s2 + $0x78] sm:$0xff]   ;;  %v1744_v33 = vld [vmem:[%s2243_s2 + $0x88] sm:$0xff]   ;;  %v520_v34 = vld [vmem:[%s2242_s1 + $0x100] sm:$0xff] }
  0x10   :  { %1548 = vmatpush3.bf16.msra.mxu0 %v1731_v9  ;;  %1556 = vmatpush3.bf16.msra.mxu1 %v1732_v10  ;;  %v497_v7 = vld [vmem:[%s2242_s1 + $0x48] sm:$0xff]  ;;  %v496_v10 = vld [vmem:[%s2242_s1 + $0x40] sm:$0xff] }
  0x11   :  { %1561 = vmatprep.subr.bf16.mxu0 %v1827_v8  ;;  %1569 = vmatprep.subr.bf16.mxu1 %v1827_v8  ;;  %v509_v9 = vld [vmem:[%s2242_s1 + $0xa8] sm:$0xff] }
  0x92   :  { %v23_v11 = vpop.xlane.xlu0 %22 }
  0x93   :  { %v28_v12 = vmul.f32 0.03125, %v23_v11  ;;  %v508_v11 = vld [vmem:[%s2242_s1 + $0xa0] sm:$0xff] }
  0x95   :  { %v30_v13 = vadd.f32 1e-05, %v28_v12 }
  0x96   :  { %v26_v14 = vpop.xlane.xlu0 %25 }
  0x97   :  { %v29_v15 = vmul.f32 0.03125, %v26_v14  ;;  %1755 = vrsqrt.f32 %v30_v13 }
  0x99   :  { %v31_v16 = vadd.f32 1e-05, %v29_v15 }
  0x9b   :  { %1757 = vrsqrt.f32 %v31_v16 }
  0xa1   :  { %v1756_v17 = vpop.eup %1755 }
  0xa2   :  { %v34_v19 = vmul.f32 %v1756_v17, %v1856_v0  ;;  %v499_v17 = vld [vmem:[%s2242_s1 + $0x58] sm:$0xff] }
  0xa5   :  { %v1758_v18 = vpop.eup %1757 }
  0xa6   :  { %v35_v20 = vmul.f32 %v1758_v18, %v1861_v1 }
  0xa8   :  { %v36_v23 = vpack.c.bf16 %v35_v20, %v34_v19  ;;  %v511_v19 = vld [vmem:[%s2242_s1 + $0xb8] sm:$0xff]  ;;  %v498_v20 = vld [vmem:[%s2242_s1 + $0x50] sm:$0xff] }
  0xaa   :  { %1550 = vmatmul.mubr.msk.bf16.vlgmr.msra.gmra.mrb[0].mxu0 %vm20_vm0, %v36_v23  ;;  %1558 = vmatmul.mubr.msk.bf16.vlgmr.msra.gmra.mrb[0].mxu1 %vm20_vm0, %v36_v23 }
  0xab   :  { %1562 = vmatpush3.bf16.msra.mxu0 %v1733_v21  ;;  %1570 = vmatpush3.bf16.msra.mxu1 %v1734_v22  ;;  %v510_v22 = vld [vmem:[%s2242_s1 + $0xb0] sm:$0xff] }
  0xac   :  { %1563 = vmatprep.subr.bf16.mxu0 %v1827_v8  ;;  %1571 = vmatprep.subr.bf16.mxu1 %v1827_v8 }
  0xad   :  { %1565 = vmatprep.mubr.msk.bf16.mxu0 %vm1828_vm1, %v1827_v8  ;;  %1573 = vmatprep.mubr.msk.bf16.mxu1 %vm1828_vm1, %v1827_v8 }
  0xaf   :  { %1564 = vmatpush3.bf16.msra.mxu0 %v1735_v24  ;;  %1572 = vmatpush3.bf16.msra.mxu1 %v1736_v25 }
  0xb0   :  { %1577 = vmatprep.subr.bf16.mxu0 %v1827_v8  ;;  %1585 = vmatprep.subr.bf16.mxu1 %v1827_v8 }
  0xb2   :  { %1566 = vmatmul.mubr.msk.bf16.vlgmr.msra.gmra.mrb[4].mxu0 %vm20_vm0, %v36_v23  ;;  %1574 = vmatmul.mubr.msk.bf16.vlgmr.msra.gmra.mrb[4].mxu1 %vm20_vm0, %v36_v23 }
  0xb3   :  { %1578 = vmatpush3.bf16.msra.mxu0 %v1737_v26  ;;  %1586 = vmatpush3.bf16.msra.mxu1 %v1738_v27 }
  0xb4   :  { %1579 = vmatprep.subr.bf16.mxu0 %v1827_v8  ;;  %1587 = vmatprep.subr.bf16.mxu1 %v1827_v8 }
  0xb5   :  { %1581 = vmatprep.mubr.msk.bf16.mxu0 %vm1828_vm1, %v1827_v8  ;;  %1589 = vmatprep.mubr.msk.bf16.mxu1 %vm1828_vm1, %v1827_v8 }
  0xb7   :  { %1580 = vmatpush3.bf16.msra.mxu0 %v1739_v28  ;;  %1588 = vmatpush3.bf16.msra.mxu1 %v1740_v29  ;;  %v501_v29 = vld [vmem:[%s2242_s1 + $0x68] sm:$0xff] }
  0xb8   :  { %1593 = vmatprep.subr.bf16.mxu0 %v1827_v8  ;;  %1601 = vmatprep.subr.bf16.mxu1 %v1827_v8 }
  0xba   :  { %1582 = vmatmul.mubr.msk.bf16.vlgmr.msra.gmra.mrb[8].mxu0 %vm20_vm0, %v36_v23  ;;  %1590 = vmatmul.mubr.msk.bf16.vlgmr.msra.gmra.mrb[8].mxu1 %vm20_vm0, %v36_v23 }
  0xbb   :  { %1594 = vmatpush3.bf16.msra.mxu0 %v1741_v30  ;;  %1602 = vmatpush3.bf16.msra.mxu1 %v1742_v31 }
  0xbc   :  { %1595 = vmatprep.subr.bf16.mxu0 %v1827_v8  ;;  %1603 = vmatprep.subr.bf16.mxu1 %v1827_v8 }
  0xbd   :  { %1597 = vmatprep.mubr.msk.bf16.mxu0 %vm1828_vm1, %v1827_v8  ;;  %1605 = vmatprep.mubr.msk.bf16.mxu1 %vm1828_vm1, %v1827_v8 }
  0xbf   :  { %1596 = vmatpush3.bf16.msra.mxu0 %v1743_v32  ;;  %1604 = vmatpush3.bf16.msra.mxu1 %v1744_v33  ;;  %v513_v32 = vld [vmem:[%s2242_s1 + $0xc8] sm:$0xff]  ;;  %v500_v33 = vld [vmem:[%s2242_s1 + $0x60] sm:$0xff] }
  0xc0   :  { %1609 = vmatprep.subr.mxu0 %v520_v34  ;;  %1705 = vmatprep.subr.mxu1 %v520_v34 }
  0xc2   :  { %1598 = vmatmul.mubr.msk.bf16.vlgmr.msra.gmra.mrb[12].mxu0 %vm20_vm0, %v36_v23  ;;  %1606 = vmatmul.mubr.msk.bf16.vlgmr.msra.gmra.mrb[12].mxu1 %vm20_vm0, %v36_v23 }
  0xc3   :  { %1610 = vmatpush3.msra.mxu0 %v520_v34  ;;  %1706 = vmatpush3.msra.mxu1 %v520_v34 }
 0x17d   :  { %v90_v35 = vpop.f32.mrb[0].mxu0  ;;  %v1962_v36 = vpop.f32.mrb[0].mxu1 }
 0x17e   :  { %v1551_v37 = vpop.f32.mrb[1].mxu0  ;;  %v1559_v38 = vpop.f32.mrb[1].mxu1  ;;  %1611 = vmatprep.mubr.msk.f32.mxu0 %vm521_vm2, %v90_v35  ;;  %v683_v16 = vmul.f32 %v496_v10, %v90_v35  ;;  %v685_v28 = vmul.f32 %v498_v20, %v1962_v36  ;;  %v512_v35 = vld [vmem:[%s2242_s1 + $0xc0] sm:$0xff] }
 0x17f   :  { %v93_v39 = vpop.f32.mrb[2].mxu0  ;;  %v150_v40 = vpop.f32.mrb[2].mxu1 }
 0x180   :  { %v1552_v41 = vpop.f32.mrb[3].mxu0  ;;  %v1560_v42 = vpop.f32.mrb[3].mxu1  ;;  %1612 = vmatmul.mubr.msk.f32.vlgmr.msra.gmra.mrb[16].mxu0 %vm521_vm2, %v93_v39  ;;  %v684_v13 = vmul.f32 %v497_v7, %v93_v39  ;;  %v686_v25 = vmul.f32 %v499_v17, %v150_v40 }
 0x181   :  { %1614 = vmatprep.mubr.msk.f32.mxu0 %vm521_vm2, %v1962_v36  ;;  %v503_v42 = vld [vmem:[%s2242_s1 + $0x78] sm:$0xff] }
 0x184   :  { %1615 = vmatmul.mubr.msk.f32.gmra.mrb[18].mxu0 %vm521_vm2, %v150_v40 }
 0x185   :  { %v1969_v43 = vpop.f32.mrb[4].mxu0  ;;  %v1971_v44 = vpop.f32.mrb[4].mxu1 }
 0x186   :  { %v1567_v45 = vpop.f32.mrb[5].mxu0  ;;  %v1575_v46 = vpop.f32.mrb[5].mxu1  ;;  %1617 = vmatprep.mubr.msk.f32.mxu1 %vm521_vm2, %v1969_v43  ;;  %v687_v41 = vmul.f32 %v500_v33, %v1969_v43 }
 0x187   :  { %v1975_v47 = vpop.f32.mrb[6].mxu0  ;;  %v1977_v48 = vpop.f32.mrb[6].mxu1 }
 0x188   :  { %v1568_v49 = vpop.f32.mrb[7].mxu0  ;;  %v1576_v50 = vpop.f32.mrb[7].mxu1  ;;  %1618 = vmatmul.mubr.msk.f32.vlgmr.msra.gmra.mrb[16].mxu1 %vm521_vm2, %v1975_v47  ;;  %v688_v38 = vmul.f32 %v501_v29, %v1975_v47  ;;  %v514_v47 = vld [vmem:[%s2242_s1 + $0xd0] sm:$0xff] }
 0x189   :  { %1620 = vmatprep.mubr.msk.f32.mxu1 %vm521_vm2, %v1971_v44  ;;  %v515_v49 = vld [vmem:[%s2242_s1 + $0xd8] sm:$0xff]  ;;  %v502_v50 = vld [vmem:[%s2242_s1 + $0x70] sm:$0xff] }
 0x18c   :  { %1621 = vmatmul.mubr.msk.f32.gmra.mrb[18].mxu1 %vm521_vm2, %v1977_v48 }
 0x18d   :  { %v1985_v51 = vpop.f32.mrb[8].mxu0  ;;  %v1987_v52 = vpop.f32.mrb[8].mxu1 }
 0x18e   :  { %v1583_v53 = vpop.f32.mrb[9].mxu0  ;;  %v1591_v54 = vpop.f32.mrb[9].mxu1  ;;  %1623 = vmatprep.mubr.msk.f32.mxu1 %vm521_vm2, %v1985_v51 }
 0x18f   :  { %v1991_v55 = vpop.f32.mrb[10].mxu0  ;;  %v1993_v56 = vpop.f32.mrb[10].mxu1 }
 0x190   :  { %v1584_v57 = vpop.f32.mrb[11].mxu0  ;;  %v1592_v58 = vpop.f32.mrb[11].mxu1  ;;  %1624 = vmatmul.mubr.msk.f32.gmra.mrb[20].mxu1 %vm521_vm2, %v1991_v55 }
 0x191   :  { %1626 = vmatprep.mubr.msk.f32.mxu1 %vm521_vm2, %v1987_v52  ;;  %v690_v57 = vmul.f32 %v503_v42, %v1977_v48  ;;  %v516_v48 = vld [vmem:[%s2242_s1 + $0xe0] sm:$0xff] }
 0x194   :  { %1627 = vmatmul.mubr.msk.f32.gmra.mrb[22].mxu1 %vm521_vm2, %v1993_v56 }
 0x195   :  { %v432_v59 = vpop.f32.mrb[12].mxu0  ;;  %v489_v60 = vpop.f32.mrb[12].mxu1 }
 0x196   :  { %v1599_v61 = vpop.f32.mrb[13].mxu0  ;;  %v1607_v62 = vpop.f32.mrb[13].mxu1 }
 0x197   :  { %v435_v63 = vpop.f32.mrb[14].mxu0  ;;  %v492_v2 = vpop.f32.mrb[14].mxu1  ;;  %v505_v61 = vld [vmem:[%s2242_s1 + $0x88] sm:$0xff] }
 0x198   :  { %v908_v3 = vpack.c.bf16 %v435_v63, %v432_v59  ;;  %v909_v4 = vpack.c.bf16 %v492_v2, %v489_v60  ;;  %v1600_v5 = vpop.f32.mrb[15].mxu0  ;;  %v1608_v6 = vpop.f32.mrb[15].mxu1  ;;  %v689_v60 = vmul.f32 %v502_v50, %v1971_v44  ;;  %v517_v2 = vld [vmem:[%s2242_s1 + $0xe8] sm:$0xff] }
 0x199   :  { %v692_v6 = vmul.f32 %v505_v61, %v1991_v55  ;;  %v518_v55 = vld [vmem:[%s2242_s1 + $0xf0] sm:$0xff]  ;;  %v730_v50 = vld [vmem:[%s2242_s1 + $0x28] sm:$0xff] }
 0x19a   :  { %1641 = vmatprep.subr.bf16.mxu0 %v908_v3 }
 0x19b   :  { %1642 = vmatpush3.bf16.msra.mxu0 %v908_v3  ;;  %v504_v3 = vld [vmem:[%s2242_s1 + $0x80] sm:$0xff] }
 0x19c   :  { %1643 = vmatprep.subr.bf16.mxu0 %v909_v4  ;;  %v691_v10 = vmul.f32 %v504_v3, %v1985_v51 }
 0x19f   :  { %1644 = vmatpush3.bf16.msra.mxu0 %v909_v4 }
 0x1a0   :  { %1677 = vmatprep.subr.bf16.mxu0 %v1827_v8 }
 0x253   :  { %v1613_v12 = vpop.f32.mrb[16].mxu0 }
 0x254   :  { %v696_v14 = vmul.f32 %v1613_v12, %v509_v9  ;;  %v624_v15 = vpop.f32.mrb[17].mxu0 }
 0x255   :  { %v695_v18 = vmul.f32 %v624_v15, %v508_v11  ;;  %v507_v11 = vld [vmem:[%s2242_s1 + $0x98] sm:$0xff]  ;;  %v506_v15 = vld [vmem:[%s2242_s1 + $0x90] sm:$0xff] }
 0x256   :  { %v708_v21 = vadd.f32 %v696_v14, %v684_v13  ;;  %v519_v14 = vld [vmem:[%s2242_s1 + $0xf8] sm:$0xff] }
 0x257   :  { %v707_v23 = vadd.f32 %v695_v18, %v683_v16  ;;  %v1616_v24 = vpop.f32.mrb[18].mxu0  ;;  %v694_v18 = vmul.f32 %v507_v11, %v1993_v56  ;;  %v725_v56 = vld [vmem:[%s2242_s1] sm:$0xff] }
 0x258   :  { %v698_v26 = vmul.f32 %v1616_v24, %v511_v19  ;;  %v634_v27 = vpop.f32.mrb[19].mxu0 }
 0x259   :  { %v719_v30 = vpack.c.bf16 %v708_v21, %v707_v23  ;;  %v697_v31 = vmul.f32 %v634_v27, %v510_v22  ;;  %v693_v21 = vmul.f32 %v506_v15, %v1987_v52  ;;  %v727_v52 = vld [vmem:[%s2242_s1 + $0x10] sm:$0xff] }
 0x25a   :  { %v710_v34 = vadd.f32 %v698_v26, %v686_v25 }
 0x25b   :  { %v709_v36 = vadd.f32 %v697_v31, %v685_v28  ;;  %v1619_v37 = vpop.f32.mrb[16].mxu1  ;;  %1633 = vmatprep.mubr.msk.bf16.mxu1 %vm521_vm2, %v719_v30 }
 0x25c   :  { %v700_v39 = vmul.f32 %v1619_v37, %v513_v32  ;;  %v644_v40 = vpop.f32.mrb[17].mxu1  ;;  %v726_v32 = vld [vmem:[%s2242_s1 + $0x8] sm:$0xff] }
 0x25d   :  { %v720_v45 = vpack.c.bf16 %v710_v34, %v709_v36  ;;  %v699_v46 = vmul.f32 %v644_v40, %v512_v35  ;;  %v729_v40 = vld [vmem:[%s2242_s1 + $0x20] sm:$0xff] }
 0x25e   :  { %v712_v53 = vadd.f32 %v700_v39, %v688_v38  ;;  %v728_v39 = vld [vmem:[%s2242_s1 + $0x18] sm:$0xff] }
 0x25f   :  { %v711_v43 = vadd.f32 %v699_v46, %v687_v41  ;;  %v1622_v54 = vpop.f32.mrb[18].mxu1  ;;  %v731_v46 = vld [vmem:[%s2242_s1 + $0x30] sm:$0xff] }
 0x260   :  { %v702_v58 = vmul.f32 %v1622_v54, %v515_v49  ;;  %v654_v59 = vpop.f32.mrb[19].mxu1 }
 0x261   :  { %v721_v62 = vpack.c.bf16 %v712_v53, %v711_v43  ;;  %v701_v63 = vmul.f32 %v654_v59, %v514_v47 }
 0x262   :  { %v714_v4 = vadd.f32 %v702_v58, %v690_v57 }
 0x263   :  { %v713_v44 = vadd.f32 %v701_v63, %v689_v60  ;;  %v1625_v5 = vpop.f32.mrb[20].mxu1  ;;  %v732_v60 = vld [vmem:[%s2242_s1 + $0x38] sm:$0xff] }
 0x264   :  { %v704_v7 = vmul.f32 %v1625_v5, %v517_v2  ;;  %v664_v9 = vpop.f32.mrb[21].mxu1 }
 0x265   :  { %v722_v12 = vpack.c.bf16 %v714_v4, %v713_v44  ;;  %v703_v13 = vmul.f32 %v664_v9, %v516_v48 }
 0x266   :  { %v716_v16 = vadd.f32 %v704_v7, %v692_v6 }
 0x267   :  { %v715_v51 = vadd.f32 %v703_v13, %v691_v10  ;;  %v1628_v17 = vpop.f32.mrb[22].mxu1 }
 0x268   :  { %v706_v19 = vmul.f32 %v1628_v17, %v519_v14  ;;  %v674_v20 = vpop.f32.mrb[23].mxu1 }
 0x269   :  { %v723_v22 = vpack.c.bf16 %v716_v16, %v715_v51  ;;  %v705_v23 = vmul.f32 %v674_v20, %v518_v55 }
 0x26a   :  { %v718_v24 = vadd.f32 %v706_v19, %v694_v18 }
 0x26b   :  { %v717_v25 = vadd.f32 %v705_v23, %v693_v21  ;;  %1721 = vmatprep.subr.msk.bf16.mxu1 %vm521_vm2, %v723_v22  ;;  %v746_v26 = vsel %vm521_vm2, %v723_v22, 0 }
 0x26c   :  { %1630 = vmatpush3.bf16.xpose.msra.mxu1 %v746_v26 }
 0x26d   :  { %v724_v27 = vpack.c.bf16 %v718_v24, %v717_v25 }
 0x26f   :  { %1722 = vmatprep.subr.msk.bf16.mxu1 %vm521_vm2, %v724_v27  ;;  %v749_v28 = vsel %vm521_vm2, %v724_v27, 0 }
 0x274   :  { %1632 = vmatpush3.bf16.xpose.msra.mxu1 %v749_v28 }
 0x275   :  { %1653 = vmatprep.subr.bf16.mxu1 %v1827_v8 }
 0x27b   :  { %1634 = vmatmul.mubr.msk.bf16.vlgmr.msra.gmra.mrb[24].mxu1 %vm521_vm2, %v720_v45 }
 0x27c   :  { %1637 = vmatprep.mubr.msk.bf16.mxu1 %vm521_vm2, %v721_v62 }
 0x283   :  { %1638 = vmatmul.mubr.msk.bf16.gmra.mrb[28].mxu1 %vm521_vm2, %v722_v12 }
 0x284   :  { %1655 = vmatprep.mubr.msk.bf16.mxu1 %vm1828_vm1, %v1827_v8 }
 0x34e   :  { %v1635_v29 = vpop.f32.mrb[24].mxu1 }
 0x34f   :  { %v794_v30 = vadd.f32 %v1635_v29, %v727_v52  ;;  %v785_v31 = vpop.f32.mrb[25].mxu1 }
 0x350   :  { %v786_v33 = vadd.f32 %v785_v31, %v725_v56  ;;  %v1636_v34 = vpop.f32.mrb[26].mxu1 }
 0x351   :  { %v788_v35 = vpop.f32.mrb[27].mxu1  ;;  %v822_v36 = vsel %vm20_vm0, %v794_v30, -inf  ;;  %v797_v41 = vadd.f32 %v1636_v34, %v728_v39 }
 0x352   :  { %v789_v37 = vadd.f32 %v788_v35, %v726_v32  ;;  %823 = vmax.xlane.f32.xlu0 %v822_v36  ;;  %v816_v38 = vsel %vm20_vm0, %v786_v33, -inf }
 0x353   :  { %817 = vmax.xlane.f32.xlu1 %v816_v38  ;;  %v825_v59 = vsel %vm20_vm0, %v797_v41, -inf  ;;  %v987_v38 = vld [vmem:[%s2243_s2 + $0x90] sm:$0xf] }
 0x354   :  { %v819_v45 = vsel %vm20_vm0, %v789_v37, -inf  ;;  %v994_v39 = vsel %vm992_vm3, %v987_v38, 0 }
 0x355   :  { %1654 = vmatpush3.bf16.msra.mxu1 %v994_v39 }
 0x356   :  { %v1639_v42 = vpop.f32.mrb[28].mxu1  ;;  %1659 = vmatprep.subr.bf16.mxu1 %v1827_v8 }
 0x357   :  { %v801_v49 = vpop.f32.mrb[29].mxu1  ;;  %820 = vmax.xlane.f32.xlu1 %v819_v45  ;;  %v810_v54 = vadd.f32 %v1639_v42, %v731_v46 }
 0x358   :  { %v802_v53 = vadd.f32 %v801_v49, %v729_v40  ;;  %v1640_v47 = vpop.f32.mrb[30].mxu1 }
 0x359   :  { %v804_v43 = vpop.f32.mrb[31].mxu1  ;;  %v813_v61 = vadd.f32 %v1640_v47, %v732_v60  ;;  %v834_v62 = vsel %vm20_vm0, %v810_v54, -inf }
 0x35a   :  { %v805_v57 = vadd.f32 %v804_v43, %v730_v50  ;;  %v828_v58 = vsel %vm20_vm0, %v802_v53, -inf }
 0x35b   :  { %829 = vmax.xlane.f32.xlu0 %v828_v58  ;;  %826 = vmax.xlane.f32.xlu1 %v825_v59  ;;  %v837_v2 = vsel %vm20_vm0, %v813_v61, -inf }
 0x35c   :  { %v831_v63 = vsel %vm20_vm0, %v805_v57, -inf }
 0x35f   :  { %835 = vmax.xlane.f32.xlu0 %v834_v62  ;;  %832 = vmax.xlane.f32.xlu1 %v831_v63 }
 0x363   :  { %838 = vmax.xlane.f32.xlu1 %v837_v2 }
 0x3df   :  { %v824_v3 = vpop.xlane.xlu0 %823 }
 0x3e0   :  { %v842_v4 = vsub.f32 %v794_v30, %v824_v3  ;;  %v818_v48 = vpop.xlane.xlu1 %817 }
 0x3e1   :  { %v840_v44 = vsub.f32 %v786_v33, %v818_v48 }
 0x3e2   :  { %v852_v5 = vmul.f32 1.442695, %v842_v4 }
 0x3e3   :  { %v848_v6 = vmul.f32 1.442695, %v840_v44 }
 0x3e4   :  { %v821_v7 = vpop.xlane.xlu1 %820 }
 0x3e5   :  { %1759 = vpow2.f32 %v848_v6  ;;  %v841_v9 = vsub.f32 %v789_v37, %v821_v7 }
 0x3e6   :  { %1761 = vpow2.f32 %v852_v5 }
 0x3e7   :  { %v850_v10 = vmul.f32 1.442695, %v841_v9 }
 0x3e8   :  { %v830_v11 = vpop.xlane.xlu0 %829  ;;  %v827_v12 = vpop.xlane.xlu1 %826 }
 0x3e9   :  { %1763 = vpow2.f32 %v850_v10  ;;  %v844_v13 = vsub.f32 %v802_v53, %v830_v11  ;;  %v843_v14 = vsub.f32 %v797_v41, %v827_v12 }
 0x3eb   :  { %v856_v15 = vmul.f32 1.442695, %v844_v13  ;;  %v854_v16 = vmul.f32 1.442695, %v843_v14  ;;  %v1039_v13 = vld [vmem:[%s2243_s2 + $0x94] sm:$0xf] }
 0x3ec   :  { %v836_v55 = vpop.xlane.xlu0 %835  ;;  %v833_v51 = vpop.xlane.xlu1 %832 }
 0x3ed   :  { %1765 = vpow2.f32 %v856_v15  ;;  %v846_v17 = vsub.f32 %v810_v54, %v836_v55  ;;  %v845_v18 = vsub.f32 %v805_v57, %v833_v51  ;;  %v1045_v51 = vsel %vm992_vm3, %v1039_v13, 0 }
 0x3ee   :  { %1767 = vpow2.f32 %v854_v16 }
 0x3ef   :  { %v1760_v19 = vpop.eup %1759  ;;  %v860_v20 = vmul.f32 1.442695, %v846_v17  ;;  %v858_v21 = vmul.f32 1.442695, %v845_v18 }
 0x3f0   :  { %v839_v22 = vpop.xlane.xlu1 %838  ;;  %v864_v23 = vsel %vm20_vm0, %v1760_v19, 0.0  ;;  %v1762_v24 = vpop.eup %1761 }
 0x3f1   :  { %1769 = vpow2.f32 %v860_v20  ;;  %v847_v25 = vsub.f32 %v813_v61, %v839_v22  ;;  %865 = vadd.xlane.f32.xlu0 %v864_v23  ;;  %v870_v28 = vsel %vm20_vm0, %v1762_v24, 0.0  ;;  %v1090_v23 = vld [vmem:[%s2243_s2 + $0x98] sm:$0xf] }
 0x3f2   :  { %1771 = vpow2.f32 %v858_v21 }
 0x3f3   :  { %v1764_v26 = vpop.eup %1763  ;;  %v862_v27 = vmul.f32 1.442695, %v847_v25  ;;  %v1141_v25 = vld [vmem:[%s2243_s2 + $0x9c] sm:$0xf] }
 0x3f4   :  { %v867_v52 = vsel %vm20_vm0, %v1764_v26, 0.0 }
 0x3f5   :  { %1773 = vpow2.f32 %v862_v27  ;;  %871 = vadd.xlane.f32.xlu0 %v870_v28  ;;  %868 = vadd.xlane.f32.xlu1 %v867_v52 }
 0x3f7   :  { %v1766_v56 = vpop.eup %1765 }
 0x3f8   :  { %v1768_v29 = vpop.eup %1767  ;;  %v876_v30 = vsel %vm20_vm0, %v1766_v56, 0.0 }
 0x3f9   :  { %877 = vadd.xlane.f32.xlu0 %v876_v30  ;;  %v873_v31 = vsel %vm20_vm0, %v1768_v29, 0.0 }
 0x3fa   :  { %874 = vadd.xlane.f32.xlu1 %v873_v31 }
 0x3fb   :  { %v1770_v32 = vpop.eup %1769 }
 0x3fc   :  { %v1772_v33 = vpop.eup %1771  ;;  %v882_v34 = vsel %vm20_vm0, %v1770_v32, 0.0 }
 0x3fd   :  { %883 = vadd.xlane.f32.xlu0 %v882_v34  ;;  %v879_v35 = vsel %vm20_vm0, %v1772_v33, 0.0 }
 0x3fe   :  { %880 = vadd.xlane.f32.xlu1 %v879_v35 }
 0x3ff   :  { %v1774_v36 = vpop.eup %1773 }
 0x400   :  { %v885_v37 = vsel %vm20_vm0, %v1774_v36, 0.0 }
 0x402   :  { %886 = vadd.xlane.f32.xlu1 %v885_v37 }
 0x47e   :  { %v866_v40 = vpop.xlane.xlu0 %865 }
 0x47f   :  { %1775 = vrcp.f32 %v866_v40 }
 0x482   :  { %v872_v41 = vpop.xlane.xlu0 %871  ;;  %v869_v42 = vpop.xlane.xlu1 %868 }
 0x483   :  { %1777 = vrcp.f32 %v869_v42 }
 0x484   :  { %1779 = vrcp.f32 %v872_v41 }
 0x486   :  { %v878_v45 = vpop.xlane.xlu0 %877 }
 0x487   :  { %v875_v46 = vpop.xlane.xlu1 %874 }
 0x488   :  { %1781 = vrcp.f32 %v875_v46 }
 0x489   :  { %1783 = vrcp.f32 %v878_v45  ;;  %v1776_v53 = vpop.eup %1775 }
 0x48a   :  { %v884_v49 = vpop.xlane.xlu0 %883  ;;  %v896_v54 = vmul.f32 %v1776_v53, %v1760_v19  ;;  %v1748_v53 = vld [vmem:[%s2243_s2 + $0xa8] sm:$0xff]  }
 0x48b   :  { %v881_v50 = vpop.xlane.xlu1 %880 }
 0x48c   :  { %1785 = vrcp.f32 %v881_v50  ;;  %v1747_v50 = vld [vmem:[%s2243_s2 + $0xa0] sm:$0xff]  }
 0x48d   :  { %v1778_v47 = vpop.eup %1777  ;;  %1787 = vrcp.f32 %v884_v49 }
 0x48e   :  { %v897_v57 = vmul.f32 %v1778_v47, %v1764_v26  ;;  %v1780_v58 = vpop.eup %1779  ;;  %v1147_v26 = vsel %vm992_vm3, %v1141_v25, 0  ;;  %v1749_v47 = vld [vmem:[%s2243_s2 + $0xb0] sm:$0xff]  }
 0x48f   :  { %v887_v43 = vpop.xlane.xlu1 %886  ;;  %v898_v61 = vmul.f32 %v1780_v58, %v1762_v24  ;;  %v1096_v24 = vsel %vm992_vm3, %v1090_v23, 0  ;;  %v1753_v58 = vld [vmem:[%s2243_s2 + $0xd0] sm:$0xff]  }
 0x490   :  { %1789 = vrcp.f32 %v887_v43  ;;  %v904_v59 = vpack.c.bf16 %v897_v57, %v896_v54  ;;  %v1750_v43 = vld [vmem:[%s2243_s2 + $0xb8] sm:$0xff]   ;;  %v1751_v54 = vld [vmem:[%s2243_s2 + $0xc0] sm:$0xff]   ;;  %v1752_v57 = vld [vmem:[%s2243_s2 + $0xc8] sm:$0xff]  }
 0x492   :  { %v1782_v60 = vpop.eup %1781  ;;  %1645 = vmatprep.mubr.msk.bf16.mxu0 %vm20_vm0, %v904_v59  ;;  %v1754_v59 = vld [vmem:[%s2243_s2 + $0xd8] sm:$0xff]  }
 0x493   :  { %v899_v62 = vmul.f32 %v1782_v60, %v1768_v29  ;;  %v1784_v63 = vpop.eup %1783 }
 0x494   :  { %v900_v4 = vmul.f32 %v1784_v63, %v1766_v56 }
 0x495   :  { %v905_v2 = vpack.c.bf16 %v899_v62, %v898_v61 }
 0x496   :  { %v1786_v3 = vpop.eup %1785 }
 0x497   :  { %1646 = vmatmul.mubr.msk.bf16.vlgmr.msra.gmra.mrb[20].mxu0 %vm20_vm0, %v905_v2  ;;  %v901_v48 = vmul.f32 %v1786_v3, %v1772_v33  ;;  %v1788_v44 = vpop.eup %1787 }
 0x498   :  { %v902_v7 = vmul.f32 %v1788_v44, %v1770_v32 }
 0x499   :  { %v906_v5 = vpack.c.bf16 %v901_v48, %v900_v4 }
 0x49a   :  { %v1790_v6 = vpop.eup %1789 }
 0x49b   :  { %1649 = vmatprep.mubr.msk.bf16.mxu0 %vm20_vm0, %v906_v5  ;;  %v903_v9 = vmul.f32 %v1790_v6, %v1774_v36 }
 0x49d   :  { %v907_v10 = vpack.c.bf16 %v903_v9, %v902_v7 }
 0x49f   :  { %1650 = vmatmul.mubr.msk.bf16.gmra.mrb[24].mxu0 %vm20_vm0, %v907_v10 }
 0x4a0   :  { %1681 = vmatprep.mubr.msk.bf16.mxu0 %vm1828_vm1, %v1827_v8 }
 0x56a   :  { %v1647_v11 = vpop.f32.mrb[20].mxu0 }
 0x56b   :  { %v956_v12 = vpop.f32.mrb[21].mxu0 }
 0x56c   :  { %v1648_v14 = vpop.f32.mrb[22].mxu0 }
 0x56d   :  { %v1040_v15 = vpack.c.bf16 %v1648_v14, %v1647_v11  ;;  %v959_v16 = vpop.f32.mrb[23].mxu0 }
 0x56e   :  { %v988_v55 = vpack.c.bf16 %v959_v16, %v956_v12 }
 0x570   :  { %1656 = vmatmul.mubr.msk.bf16.vlgmr.msra.gmra.mrb[32].mxu1 %vm521_vm2, %v988_v55 }
 0x571   :  { %1660 = vmatpush3.bf16.msra.mxu1 %v1045_v51  ;;  %1661 = vmatprep.mubr.msk.bf16.mxu1 %vm1828_vm1, %v1827_v8 }
 0x572   :  { %v1651_v17 = vpop.f32.mrb[24].mxu0  ;;  %1665 = vmatprep.subr.bf16.mxu1 %v1827_v8 }
 0x573   :  { %v972_v18 = vpop.f32.mrb[25].mxu0 }
 0x574   :  { %v1652_v19 = vpop.f32.mrb[26].mxu0 }
 0x575   :  { %v1142_v20 = vpack.c.bf16 %v1652_v19, %v1651_v17  ;;  %v975_v21 = vpop.f32.mrb[27].mxu0 }
 0x576   :  { %v1091_v22 = vpack.c.bf16 %v975_v21, %v972_v18 }
 0x57c   :  { %1662 = vmatmul.mubr.msk.bf16.vlgmr.msra.gmra.mrb[32].mxu1 %vm521_vm2, %v1040_v15 }
 0x57d   :  { %1666 = vmatpush3.bf16.msra.mxu1 %v1096_v24  ;;  %1667 = vmatprep.mubr.msk.bf16.mxu1 %vm1828_vm1, %v1827_v8 }
 0x57e   :  { %1671 = vmatprep.subr.bf16.mxu1 %v1827_v8 }
 0x588   :  { %1668 = vmatmul.mubr.msk.bf16.vlgmr.msra.gmra.mrb[32].mxu1 %vm521_vm2, %v1091_v22 }
 0x589   :  { %1672 = vmatpush3.bf16.msra.mxu1 %v1147_v26  ;;  %1673 = vmatprep.mubr.msk.bf16.mxu1 %vm1828_vm1, %v1827_v8 }
 0x594   :  { %1674 = vmatmul.mubr.msk.bf16.vlgmr.msra.gmra.mrb[32].mxu1 %vm521_vm2, %v1142_v20 }
 0x667   :  { %v1183_v27 = vpop.f32.mrb[32].mxu1 }
 0x668   :  { %v2170_v28 = vadd.f32 %v1183_v27, %v1856_v0  ;;  %v1675_v52 = vpop.f32.mrb[33].mxu1  ;;  %v1745_v0 = vld [vmem:[%s2243_s2] sm:$0xff]  }
 0x669   :  { %v1186_v56 = vpop.f32.mrb[34].mxu1  ;;  %1678 = vmatpush3.bf16.msra.mxu0 %v1745_v0 }
 0x66a   :  { %v2173_v29 = vadd.f32 %v1186_v56, %v1861_v1  ;;  %v1676_v30 = vpop.f32.mrb[35].mxu1  ;;  %v1192_v31 = vmul.f32 %v2170_v28, %v2170_v28  ;;  %1679 = vmatprep.subr.bf16.mxu0 %v1827_v8  ;;  %v1746_v1 = vld [vmem:[%s2243_s2 + $0x8] sm:$0xff]   ;;  %s1830_s2 = smov [#allocation2]  }
 0x66b   :  { %s1404_s1 = sshll.u32 %s1830_s2, 4  ;;  %s1405_s1 = int_to_ptr.vmem [resolvable:$true] %s1404_s1 }
 0x66c   :  { %v1194_v32 = vsel %vm20_vm0, %v1192_v31, 0.0  ;;  %v1193_v33 = vmul.f32 %v2173_v29, %v2173_v29  ;;  %s1803_s29 = scalar_lea.vmem %s1405_s1, 256  ;;  %p1808_p1 = scmp.lt.s32.totalorder %s1405_s1, %s1405_s1 }
 0x66d   :  { %1195 = vadd.xlane.f32.xlu0 %v1194_v32  ;;  %1680 = vmatpush3.bf16.msra.mxu0 %v1746_v1  ;;  %p1804_p0 = scmp.ne.s32.totalorder %s1405_s1, %s1803_s29  ;;  %p1809_p2 = scmp.lt.s32.totalorder %s1803_s29, %s1803_s29 }
 0x66e   :  { %v1197_v34 = vsel %vm20_vm0, %v1193_v33, 0.0  ;;  %1685 = vmatprep.subr.bf16.mxu0 %v1827_v8 }
 0x66f   :  { %1198 = vadd.xlane.f32.xlu1 %v1197_v34  ;;  %p1810_p3 = por %p1809_p2, %p1808_p1 }
 0x671   :  { %p1811_p4 = pnand %p1810_p3, %p1804_p0 }
 0x6fa   :  { %v1196_v35 = vpop.xlane.xlu0 %1195 }
 0x6fb   :  { %v1200_v36 = vmul.f32 0.03125, %v1196_v35 }
 0x6fc   :  { %v1199_v37 = vpop.xlane.xlu1 %1198 }
 0x6fd   :  { %v1202_v38 = vadd.f32 1e-05, %v1200_v36  ;;  %v1201_v39 = vmul.f32 0.03125, %v1199_v37 }
 0x6ff   :  { %1791 = vrsqrt.f32 %v1202_v38  ;;  %v1203_v40 = vadd.f32 1e-05, %v1201_v39 }
 0x701   :  { %1793 = vrsqrt.f32 %v1203_v40 }
 0x709   :  { %v1792_v41 = vpop.eup %1791 }
 0x70a   :  { %v1206_v45 = vmul.f32 %v1792_v41, %v2170_v28 }
 0x70b   :  { %v1794_v42 = vpop.eup %1793 }
 0x70c   :  { %v1207_v46 = vmul.f32 %v1794_v42, %v2173_v29 }
 0x70e   :  { %v1208_v49 = vpack.c.bf16 %v1207_v46, %v1206_v45 }
 0x710   :  { %1682 = vmatmul.mubr.msk.bf16.vlgmr.msra.gmra.mrb[28].mxu0 %vm20_vm0, %v1208_v49 }
 0x711   :  { %1701 = vmatprep.mubr.msk.bf16.mxu0 %vm1828_vm1, %v1827_v8  ;;  %1686 = vmatpush3.bf16.msra.mxu0 %v1747_v50 }
 0x712   :  { %1687 = vmatprep.subr.bf16.mxu0 %v1827_v8 }
 0x715   :  { %1688 = vmatpush3.bf16.msra.mxu0 %v1748_v53 }
 0x716   :  { %1689 = vmatprep.subr.bf16.mxu0 %v1827_v8 }
 0x719   :  { %1690 = vmatpush3.bf16.msra.mxu0 %v1749_v47 }
 0x71a   :  { %1691 = vmatprep.subr.bf16.mxu0 %v1827_v8 }
 0x71d   :  { %1692 = vmatpush3.bf16.msra.mxu0 %v1750_v43 }
 0x71e   :  { %1693 = vmatprep.subr.bf16.mxu0 %v1827_v8 }
 0x721   :  { %1694 = vmatpush3.bf16.msra.mxu0 %v1751_v54 }
 0x722   :  { %1695 = vmatprep.subr.bf16.mxu0 %v1827_v8 }
 0x725   :  { %1696 = vmatpush3.bf16.msra.mxu0 %v1752_v57 }
 0x726   :  { %1697 = vmatprep.subr.bf16.mxu0 %v1827_v8 }
 0x729   :  { %1698 = vmatpush3.bf16.msra.mxu0 %v1753_v58 }
 0x72a   :  { %1699 = vmatprep.subr.bf16.mxu0 %v1827_v8 }
 0x72d   :  { %1700 = vmatpush3.bf16.msra.mxu0 %v1754_v59 }
 0x7e3   :  { %v1262_v60 = vpop.f32.mrb[28].mxu0 }
 0x7e4   :  { %1283 = vrot.lane.b32.xlu0 %v1262_v60, %s1829_s28  ;;  %v1683_v61 = vpop.f32.mrb[29].mxu0  ;;  %v1466_v2 = vmul.f32 -1.442695, %v1262_v60 }
 0x7e5   :  { %v1265_v62 = vpop.f32.mrb[30].mxu0 }
 0x7e6   :  { %1285 = vrot.lane.b32.xlu1 %v1265_v62, %s1829_s28  ;;  %v1684_v63 = vpop.f32.mrb[31].mxu0  ;;  %v1467_v3 = vmul.f32 -1.442695, %v1265_v62  ;;  %1795 = vpow2.f32 %v1466_v2 }
 0x7e8   :  { %1797 = vpow2.f32 %v1467_v3 }
 0x7f0   :  { %v1796_v4 = vpop.eup %1795 }
 0x7f1   :  { %v1275_v44 = vadd.f32 1.0, %v1796_v4 }
 0x7f2   :  { %v1798_v48 = vpop.eup %1797 }
 0x7f3   :  { %v1276_v8 = vadd.f32 1.0, %v1798_v48  ;;  %1799 = vrcp.f32 %v1275_v44 }
 0x7f5   :  { %1801 = vrcp.f32 %v1276_v8 }
 0x7fd   :  { %v1800_v5 = vpop.eup %1799 }
 0x7fe   :  { %v1281_v9 = vmul.f32 %v1800_v5, %v1262_v60 }
 0x7ff   :  { %v1802_v6 = vpop.eup %1801 }
 0x800   :  { %v1282_v10 = vmul.f32 %v1802_v6, %v1265_v62 }
 0x856   :  { %v1284_v7 = vpop.permute.xlu0 %1283 }
 0x857   :  { %v1287_v12 = vmul.f32 %v1284_v7, %v1281_v9 }
 0x858   :  { %v1286_v11 = vpop.permute.xlu1 %1285 }
 0x859   :  { %v1288_v13 = vmul.f32 %v1286_v11, %v1282_v10 }
 0x85b   :  { %v1289_v14 = vpack.c.bf16 %v1288_v13, %v1287_v12 }
 0x85d   :  { %1702 = vmatmul.mubr.bf16.vlgmr.msra.gmra.mrb[32].mxu0 %v1289_v14 }
 0x930   :  { %v1388_v15 = vpop.f32.mrb[32].mxu0 }
 0x931   :  { %v1395_v16 = vadd.f32 %v2170_v28, %v1388_v15  ;;  %v1703_v55 = vpop.f32.mrb[33].mxu0 }
 0x932   :  { %v1391_v51 = vpop.f32.mrb[34].mxu0 }
 0x933   :  { %1397 = vst.msk [vmem:[#allocation2] sm:$0xff] %vm20_vm0, %v1395_v16  ;;  %v1396_v17 = vadd.f32 %v2173_v29, %v1391_v51  ;;  %v1704_v18 = vpop.f32.mrb[35].mxu0 }
 0x935   :  { %1398 = vst.msk [vmem:[#allocation2 + $0x8] sm:$0xff] %vm20_vm0, %v1396_v17 }
 0x936   :  { %1814 = shalt.err (!%p1811_p4)
}
 0x937   :  { %s1815_s5 = scalar_lea.hbm %s2244_s3, 256 }
 0x938   :  { %p1816_p5 = scmp.ne.s32.totalorder %s2244_s3, %s1815_s5  ;;  %p1819_p6 = scmp.lt.u32.totalorder %s1815_s5, %s2244_s3 }
 0x93a   :  { %p1821_p7 = pnand %p1819_p6, %p1816_p5 }
 0x93c   :  { %1824 = shalt.err (!%p1821_p7)
}
 0x93d   :  { %s1831_s10 = smov 128   ;;  %s1832_s11 = smov 8  }
 0x93e   :  { %1410 = dma.vmem_to_hbm [thread:$0]  %s1405_s1, 256, %s2244_s3, [#allocation3], %s1831_s10, %s1831_s10, %s1832_s11  }
 0x93f   :  { %1825 = dma.done.wait [#allocation3], 256  }
 0x940   :  { %1826 = vsyncadd [#allocation3], 4294967040 }
 0x941   :  { %1414 = vsyncpa [#allocation3], 1 }

</bundles_post_ra>
